<compile_context>
chip_gen: v7x
topology: tpu7x:2x2x1
jax: 0.10.0
libtpu: 0.0.40
codegen_flags: <defaults>
</compile_context>

<pallas_src>
import functools

import jax
import jax.numpy as jnp
from jax import lax
from jax.experimental import pallas as pl
from jax.experimental.pallas import tpu as pltpu

_MAX_ROWS = 256    # row tile of the im2col matrix per grid step
_ROW_ALIGN = 8     # f32 sublane alignment


def _round_up(x, m):
    return ((x + m - 1) // m) * m


# -----------------------------------------------------------------------------
# Fused Pallas kernel:  y = patches @ W + b ; optional LeakyReLU(0.2) ;
# optional alpha fade-in blend (alpha is a static python float).
# -----------------------------------------------------------------------------
def _fused_mm_kernel(*refs, leaky, blend, alpha):
    it = iter(refs)
    x_ref = next(it)                        # (TM, K)    f32 im2col patches
    w_ref = next(it)                        # (K, Cout)  f32 reshaped conv weight
    b_ref = next(it)                        # (1, Cout)  f32 bias
    h_ref = next(it) if blend else None     # (TM, Cout) f32 pooled h (fade-in)
    o_ref = next(it)                        # (TM, Cout) f32 output

    y = jnp.dot(x_ref[...], w_ref[...], preferred_element_type=jnp.float32)
    y = y + b_ref[...]
    if leaky:
        y = jnp.where(y >= 0.0, y, 0.2 * y)
    if blend:
        y = alpha * h_ref[...] + (1.0 - alpha) * y
    o_ref[...] = y.astype(o_ref.dtype)


def _fused_matmul(patches, w2d, bias, *, leaky, h2d=None, alpha=1.0):
    """patches: (M, K) f32, w2d: (K, Cout) f32, bias: (1, Cout) f32."""
    M, K = patches.shape
    Cout = w2d.shape[1]
    blend = h2d is not None

    tm = min(_MAX_ROWS, _round_up(M, _ROW_ALIGN))
    m_pad = _round_up(M, tm)
    grid = (m_pad // tm,)

    patches = patches.astype(jnp.float32)
    if m_pad != M:
        patches = jnp.pad(patches, ((0, m_pad - M), (0, 0)))
        if blend:
            h2d = jnp.pad(h2d, ((0, m_pad - M), (0, 0)))

    in_specs = [
        pl.BlockSpec((tm, K), lambda i: (i, 0)),      # patches (streamed row tiles)
        pl.BlockSpec((K, Cout), lambda i: (0, 0)),    # weight (resident)
        pl.BlockSpec((1, Cout), lambda i: (0, 0)),    # bias
    ]
    args = [patches, w2d.astype(jnp.float32), bias.astype(jnp.float32)]
    if blend:
        in_specs.append(pl.BlockSpec((tm, Cout), lambda i: (i, 0)))
        args.append(h2d.astype(jnp.float32))

    kernel = functools.partial(_fused_mm_kernel, leaky=leaky, blend=blend,
                               alpha=float(alpha))

    out = pl.pallas_call(
        kernel,
        grid=grid,
        in_specs=in_specs,
        out_specs=pl.BlockSpec((tm, Cout), lambda i: (i, 0)),
        out_shape=jax.ShapeDtypeStruct((m_pad, Cout), jnp.float32),
        compiler_params=pltpu.CompilerParams(
            dimension_semantics=("parallel",),
            vmem_limit_bytes=32 * 1024 * 1024),
    )(*args)
    return out[:M]


# -----------------------------------------------------------------------------
# Minibatch standard deviation: global reduction kernel -> (1, 1) scalar.
# -----------------------------------------------------------------------------
def _mbstd_kernel(x_ref, o_ref, *, m_valid, n_total):
    x = x_ref[...]
    rows = lax.broadcasted_iota(jnp.int32, x.shape, 0)
    valid = rows < m_valid
    xz = jnp.where(valid, x, 0.0)
    mean = jnp.sum(xz) / n_total
    var = jnp.sum(jnp.where(valid, (x - mean) ** 2, 0.0)) / n_total
    o_ref[...] = jnp.reshape(jnp.sqrt(var + 1e-8), (1, 1))


def minibatch_std(h):
    B, H, W, C = h.shape
    M = B * H * W
    x2d = h.reshape(M, C).astype(jnp.float32)
    m_pad = _round_up(M, _ROW_ALIGN)
    if m_pad != M:
        x2d = jnp.pad(x2d, ((0, m_pad - M), (0, 0)))
    return pl.pallas_call(
        functools.partial(_mbstd_kernel, m_valid=M, n_total=float(M * C)),
        grid=(1,),
        in_specs=[pl.BlockSpec((m_pad, C), lambda i: (0, 0))],
        out_specs=pl.BlockSpec((1, 1), lambda i: (0, 0)),
        out_shape=jax.ShapeDtypeStruct((1, 1), jnp.float32),
        compiler_params=pltpu.CompilerParams(
            vmem_limit_bytes=32 * 1024 * 1024),
    )(x2d)


# -----------------------------------------------------------------------------
# Conv wrappers (im2col layout glue feeding the fused kernel)
# -----------------------------------------------------------------------------
def _ws_conv(x, w_hwio, bias, *, padding, stride, leaky, h_blend=None, alpha=1.0):
    """Generic conv: pad -> im2col (XLA glue) -> one fused Pallas matmul."""
    B, H, W, Cin = x.shape
    KH, KW, _, Cout = w_hwio.shape
    Ho = (H + 2 * padding - KH) // stride + 1
    Wo = (W + 2 * padding - KW) // stride + 1

    xp = x
    if padding:
        xp = jnp.pad(x, ((0, 0), (padding, padding), (padding, padding), (0, 0)))
    cols = [xp[:, kh: kh + (Ho - 1) * stride + 1: stride,
               kw: kw + (Wo - 1) * stride + 1: stride, :]
            for kh in range(KH) for kw in range(KW)]
    patches = jnp.concatenate(cols, axis=-1).reshape(B * Ho * Wo, KH * KW * Cin)
    w2d = w_hwio.reshape(KH * KW * Cin, Cout)

    h2d = None if h_blend is None else h_blend.reshape(B * Ho * Wo, Cout)

    y2d = _fused_matmul(patches, w2d, bias, leaky=leaky, h2d=h2d, alpha=alpha)
    return y2d.reshape(B, Ho, Wo, Cout)


def ws_conv2d(x, p, *, padding, leaky):
    """WeightScaledConv2d: weight-scale folded into the weights (conv is linear)."""
    w = p["w"] * p["scale"][0, 0]
    return _ws_conv(x, w, p["b"], padding=padding, stride=1, leaky=leaky)


def ws_conv2d_on_pooled_input(x, p, *, h_blend, alpha):
    """fromRGB(avg_pool2d(x, 2)) fused into one stride-2 6x6 conv on the raw
    input (weights = 0.25 * 2x nearest-neighbour-upsampled 3x3 weights; exact
    since pool and conv are both linear), with the alpha fade-in blend fused
    into the kernel epilogue:  out = alpha * h_blend + (1 - alpha) * prev."""
    w = p["w"] * p["scale"][0, 0]
    w = 0.25 * jnp.repeat(jnp.repeat(w, 2, axis=0), 2, axis=1)
    return _ws_conv(x, w, p["b"], padding=2, stride=2, leaky=False,
                    h_blend=h_blend, alpha=alpha)


def _avg_pool2(x):
    # TODO(synk): fold this reshape-mean into the consumer kernel's patch gather.
    B, H, W, C = x.shape
    return x.reshape(B, H // 2, 2, W // 2, 2, C).mean(axis=(2, 4))


# -----------------------------------------------------------------------------
# Discriminator forward (mirrors the PyTorch control flow; depth/alpha static)
# -----------------------------------------------------------------------------
@functools.partial(jax.jit, static_argnames=("depth", "alpha"))
def discriminator_forward(params, x_nchw, depth=0, alpha=1.0):
    x = jnp.transpose(x_nchw, (0, 2, 3, 1)).astype(jnp.float32)   # NCHW -> NHWC
    blocks = params["blocks"]
    nb = len(blocks)
    last = blocks[-1]

    first_blk = blocks[nb - (depth + 1)]
    h = ws_conv2d(x, first_blk["fromRGB"], padding=1, leaky=False)   # first=True

    if depth > 0:
        # first (non-last) block body: conv1 -> leaky -> conv2 -> leaky, then pool
        h = ws_conv2d(h, first_blk["conv1"], padding=1, leaky=True)
        h = ws_conv2d(h, first_blk["conv2"], padding=1, leaky=True)
        h = _avg_pool2(h)
        if alpha < 1.0:
            # prev = fromRGB(avg_pool(x)); h = alpha*h + (1-alpha)*prev  (fused)
            h = ws_conv2d_on_pooled_input(x, blocks[nb - depth]["fromRGB"],
                                          h_blend=h, alpha=alpha)
        for i in range(depth, 1, -1):        # remaining non-last blocks + pool
            blk = blocks[nb - i]
            h = ws_conv2d(h, blk["conv1"], padding=1, leaky=True)
            h = ws_conv2d(h, blk["conv2"], padding=1, leaky=True)
            h = _avg_pool2(h)

    # ---- last block: minibatch-std channel + conv1(3x3) + conv2(4x4, no pad) ----
    B, Hh, Wh, _ = h.shape
    std = minibatch_std(h)                                   # Pallas reduction
    std_map = jnp.broadcast_to(jnp.reshape(std, (1, 1, 1, 1)), (B, Hh, Wh, 1))
    h = jnp.concatenate([h, std_map], axis=-1)               # channel concat (glue)
    h = ws_conv2d(h, last["conv1"], padding=1, leaky=True)
    h = ws_conv2d(h, last["conv2"], padding=0, leaky=True)   # 4x4 -> 1x1

    feat = h.reshape(B, h.shape[-1])
    out = _fused_matmul(feat, params["linear"]["w"], params["linear"]["b"],
                        leaky=False)
    return out


# -----------------------------------------------------------------------------
# Deterministic parameter initialization (mirrors the PyTorch __init__)
# -----------------------------------------------------------------------------
def _init_ws_conv(key, cin, cout, kh, kw):
    kw_key, kb_key = jax.random.split(key)
    fan_in = cin * kh * kw
    w = jax.random.normal(kw_key, (kh, kw, cin, cout), jnp.float32) \
        * jnp.sqrt(2.0 / fan_in)                      # kaiming_normal_
    scale = jnp.sqrt(jnp.mean(w ** 2))
    w = w / scale
    bound = 1.0 / (fan_in ** 0.5)
    b = jax.random.uniform(kb_key, (1, cout), jnp.float32, -bound, bound)
    return {"w": w, "b": b, "scale": scale.reshape(1, 1)}


def init_discriminator(key, num_depth, num_channels, num_fmap):
    blocks = []
    for i in range(num_depth, 1, -1):
        key, k1, k2, k3 = jax.random.split(key, 4)
        blocks.append({
            "fromRGB": _init_ws_conv(k1, num_channels, num_fmap(i), 3, 3),
            "conv1": _init_ws_conv(k2, num_fmap(i), num_fmap(i - 1), 3, 3),
            "conv2": _init_ws_conv(k3, num_fmap(i - 1), num_fmap(i - 1), 3, 3),
        })
    key, k1, k2, k3, k4, k5 = jax.random.split(key, 6)
    blocks.append({
        "fromRGB": _init_ws_conv(k1, num_channels, num_fmap(1), 3, 3),
        "conv1": _init_ws_conv(k2, num_fmap(1) + 1, num_fmap(0), 3, 3),
        "conv2": _init_ws_conv(k3, num_fmap(0), num_fmap(0), 4, 4),
    })
    feat = num_fmap(0)
    bound = 1.0 / (feat ** 0.5)
    lw = jax.random.uniform(k4, (feat, 1), jnp.float32, -bound, bound)
    lb = jax.random.uniform(k5, (1, 1), jnp.float32, -bound, bound)
    return {"blocks": blocks, "linear": {"w": lw, "b": lb}}


# -----------------------------------------------------------------------------
# Pure-JAX f32 reference (for correctness only)
# -----------------------------------------------------------------------------
def _ref_ws_conv(x, p, padding, leaky):
    y = lax.conv_general_dilated(
        x * p["scale"][0, 0], p["w"], window_strides=(1, 1),
        padding=[(padding, padding), (padding, padding)],
        dimension_numbers=("NHWC", "HWIO", "NHWC"))
    y = y + p["b"].reshape(1, 1, 1, -1)
    if leaky:
        y = jnp.where(y >= 0.0, y, 0.2 * y)
    return y


def _ref_pool(x):
    B, H, W, C = x.shape
    return x.reshape(B, H // 2, 2, W // 2, 2, C).mean(axis=(2, 4))


def _ref_forward(params, x_nchw, depth, alpha):
    x = jnp.transpose(x_nchw, (0, 2, 3, 1)).astype(jnp.float32)
    blocks = params["blocks"]
    nb = len(blocks)

    def blk_fwd(blk, x, first, last):
        if first:
            x = _ref_ws_conv(x, blk["fromRGB"], 1, False)
        if last:
            m = jnp.mean(x)
            std = jnp.sqrt(jnp.mean((x - m) ** 2) + 1e-8)
            std_map = jnp.broadcast_to(std, (x.shape[0], x.shape[1], x.shape[2], 1))
            x = jnp.concatenate([x, std_map], axis=-1)
        x = _ref_ws_conv(x, blk["conv1"], 1, True)
        x = _ref_ws_conv(x, blk["conv2"], 0 if last else 1, True)
        return x

    h = blk_fwd(blocks[nb - (depth + 1)], x, True, depth == 0)
    if depth > 0:
        h = _ref_pool(h)
        if alpha < 1.0:
            x_low = _ref_pool(x)
            prev = _ref_ws_conv(x_low, blocks[nb - depth]["fromRGB"], 1, False)
            h = alpha * h + (1.0 - alpha) * prev
    for i in range(depth, 0, -1):
        h = blk_fwd(blocks[nb - i], h, False, i == 1)
        if i > 1:
            h = _ref_pool(h)
    feat = h.reshape(h.shape[0], -1)
    return feat @ params["linear"]["w"] + params["linear"]["b"]


# -----------------------------------------------------------------------------
if __name__ == "__main__":
    num_depth = 3
    num_channels = 3
    num_fmap = lambda i: 64 // (2 ** i)      # fmap(0..3) = 64, 32, 16, 8

    key = jax.random.PRNGKey(0)
    pkey, xkey = jax.random.split(key)
    params = init_discriminator(pkey, num_depth, num_channels, num_fmap)

    # (depth, alpha, resolution): default state, grown w/o fade, grown with fade
    cases = [(0, 1.0, 4), (1, 1.0, 8), (2, 0.5, 16)]
    for idx, (depth, alpha, res) in enumerate(cases):
        xk = jax.random.fold_in(xkey, idx)
        x = jax.random.normal(xk, (2, num_channels, res, res), jnp.float32)
        out = discriminator_forward(params, x, depth=depth, alpha=alpha)
        out = jax.block_until_ready(out)
        ref = _ref_forward(params, x, depth, alpha)
        assert out.shape == (2, 1), out.shape
        err = float(jnp.max(jnp.abs(out - ref)))
        scale = float(jnp.max(jnp.abs(ref)))
        assert err <= 1e-2 * max(1.0, scale), (depth, alpha, err, scale)

    print("KERNEL_OK")
</pallas_src>

<mosaic_0001>
module attributes {stable_mosaic.version = 11 : i64} {
  func.func @_mbstd_kernel(%arg0: i32, %arg1: memref<32x32xf32, #tpu.memory_space<vmem>>, %arg2: memref<1x1xf32, #tpu.memory_space<vmem>>) attributes {dimension_semantics = [#tpu.dimension_semantics<arbitrary>], iteration_bounds = array<i64: 1>, scalar_prefetch = 0 : i64, scratch_operands = 0 : i64, tpu.core_type = #tpu.core_type<tc>, window_params = [{pipeline_mode = #tpu.pipeline_mode<synchronous>, transform_indices = @transform_0, window_bounds = array<i64: 32, 32>}, {pipeline_mode = #tpu.pipeline_mode<synchronous>, transform_indices = @transform_1, window_bounds = array<i64: 1, 1>}]} {
    %c0 = arith.constant 0 : index
    %c0_0 = arith.constant 0 : index
    %0 = vector.load %arg1[%c0, %c0_0] : memref<32x32xf32, #tpu.memory_space<vmem>>, vector<32x32xf32>
    %1 = tpu.iota {dimensions = array<i32: 0>} : vector<32x32xi32>
    %c32_i32 = arith.constant 32 : i32
    %2 = vector.broadcast %c32_i32 : i32 to vector<32x32xi32>
    %3 = arith.cmpi slt, %1, %2 : vector<32x32xi32>
    %cst = arith.constant 0.000000e+00 : f32
    %4 = vector.broadcast %cst : f32 to vector<32x32xf32>
    %5 = arith.select %3, %0, %4 : vector<32x32xi1>, vector<32x32xf32>
    %6 = vector.shape_cast %5 : vector<32x32xf32> to vector<1x32x32xf32>
    %cst_1 = arith.constant dense<0.000000e+00> : vector<1xf32>
    %7 = vector.multi_reduction <add>, %6, %cst_1 [1, 2] : vector<1x32x32xf32> to vector<1xf32>
    %8 = vector.shape_cast %7 : vector<1xf32> to vector<1x1x1xf32>
    %9 = vector.extract %8[0, 0, 0] : f32 from vector<1x1x1xf32>
    %cst_2 = arith.constant 1.024000e+03 : f32
    %10 = arith.divf %9, %cst_2 : f32
    %11 = vector.broadcast %10 : f32 to vector<32x32xf32>
    %12 = arith.subf %0, %11 : vector<32x32xf32>
    %13 = arith.mulf %12, %12 : vector<32x32xf32>
    %cst_3 = arith.constant 0.000000e+00 : f32
    %14 = vector.broadcast %cst_3 : f32 to vector<32x32xf32>
    %15 = arith.select %3, %13, %14 : vector<32x32xi1>, vector<32x32xf32>
    %16 = vector.shape_cast %15 : vector<32x32xf32> to vector<1x32x32xf32>
    %cst_4 = arith.constant dense<0.000000e+00> : vector<1xf32>
    %17 = vector.multi_reduction <add>, %16, %cst_4 [1, 2] : vector<1x32x32xf32> to vector<1xf32>
    %18 = vector.shape_cast %17 : vector<1xf32> to vector<1x1x1xf32>
    %19 = vector.extract %18[0, 0, 0] : f32 from vector<1x1x1xf32>
    %cst_5 = arith.constant 1.024000e+03 : f32
    %20 = arith.divf %19, %cst_5 : f32
    %cst_6 = arith.constant 9.99999993E-9 : f32
    %21 = arith.addf %20, %cst_6 : f32
    %22 = math.sqrt %21 : f32
    %23 = vector.broadcast %22 : f32 to vector<1x1xf32>
    %c0_7 = arith.constant 0 : index
    %c0_8 = arith.constant 0 : index
    %24 = vector.load %arg2[%c0_7, %c0_8] : memref<1x1xf32, #tpu.memory_space<vmem>>, vector<1x1xf32>
    tpu.vector_store %arg2[%c0_7, %c0_8], %23 {strides = array<i32>} : memref<1x1xf32, #tpu.memory_space<vmem>>, vector<1x1xf32>,
    return
  }
  func.func @transform_0(%arg0: i32) -> (i32, i32) {
    %c0_i32 = arith.constant 0 : i32
    %c0_i32_0 = arith.constant 0 : i32
    %c0_i32_1 = arith.constant 0 : i32
    return %c0_i32, %c0_i32_0 : i32, i32
  }
  func.func @transform_1(%arg0: i32) -> (i32, i32) {
    %c0_i32 = arith.constant 0 : i32
    %c0_i32_0 = arith.constant 0 : i32
    %c0_i32_1 = arith.constant 0 : i32
    return %c0_i32, %c0_i32_0 : i32, i32
  }
}

module attributes {stable_mosaic.version = 11 : i64} {
  func.func @_fused_mm_kernel(%arg0: i32, %arg1: memref<32x27xf32, #tpu.memory_space<vmem>>, %arg2: memref<27x32xf32, #tpu.memory_space<vmem>>, %arg3: memref<1x32xf32, #tpu.memory_space<vmem>>, %arg4: memref<32x32xf32, #tpu.memory_space<vmem>>) attributes {dimension_semantics = [#tpu.dimension_semantics<parallel>], iteration_bounds = array<i64: 1>, scalar_prefetch = 0 : i64, scratch_operands = 0 : i64, tpu.core_type = #tpu.core_type<tc>, window_params = [{transform_indices = @transform_0, window_bounds = array<i64: 32, 27>}, {pipeline_mode = #tpu.pipeline_mode<synchronous>, transform_indices = @transform_1, window_bounds = array<i64: 27, 32>}, {pipeline_mode = #tpu.pipeline_mode<synchronous>, transform_indices = @transform_2, window_bounds = array<i64: 1, 32>}, {transform_indices = @transform_3, window_bounds = array<i64: 32, 32>}]} {
    %c0 = arith.constant 0 : index
    %c0_0 = arith.constant 0 : index
    %0 = vector.load %arg1[%c0, %c0_0] : memref<32x27xf32, #tpu.memory_space<vmem>>, vector<32x27xf32>
    %c0_1 = arith.constant 0 : index
    %c0_2 = arith.constant 0 : index
    %1 = vector.load %arg2[%c0_1, %c0_2] : memref<27x32xf32, #tpu.memory_space<vmem>>, vector<27x32xf32>
    %cst = arith.constant dense<0.000000e+00> : vector<32x32xf32>
    %2 = tpu.matmul %0, %1, %cst {dimension_numbers = #tpu.dot_dimension_numbers<[1], [0], [0], [1], [0, 0, 1, 1], [], []>} : vector<32x27xf32>, vector<27x32xf32>, vector<32x32xf32> -> vector<32x32xf32>
    %c0_3 = arith.constant 0 : index
    %c0_4 = arith.constant 0 : index
    %3 = vector.load %arg3[%c0_3, %c0_4] : memref<1x32xf32, #tpu.memory_space<vmem>>, vector<1x32xf32>
    %4 = vector.broadcast %3 : vector<1x32xf32> to vector<32x32xf32>
    %5 = arith.addf %2, %4 : vector<32x32xf32>
    %c0_5 = arith.constant 0 : index
    %c0_6 = arith.constant 0 : index
    %6 = vector.load %arg4[%c0_5, %c0_6] : memref<32x32xf32, #tpu.memory_space<vmem>>, vector<32x32xf32>
    tpu.vector_store %arg4[%c0_5, %c0_6], %5 {strides = array<i32>} : memref<32x32xf32, #tpu.memory_space<vmem>>, vector<32x32xf32>,
    return
  }
  func.func @transform_0(%arg0: i32) -> (i32, i32) {
    %c0_i32 = arith.constant 0 : i32
    %c0_i32_0 = arith.constant 0 : i32
    return %arg0, %c0_i32 : i32, i32
  }
  func.func @transform_1(%arg0: i32) -> (i32, i32) {
    %c0_i32 = arith.constant 0 : i32
    %c0_i32_0 = arith.constant 0 : i32
    %c0_i32_1 = arith.constant 0 : i32
    return %c0_i32, %c0_i32_0 : i32, i32
  }
  func.func @transform_2(%arg0: i32) -> (i32, i32) {
    %c0_i32 = arith.constant 0 : i32
    %c0_i32_0 = arith.constant 0 : i32
    %c0_i32_1 = arith.constant 0 : i32
    return %c0_i32, %c0_i32_0 : i32, i32
  }
  func.func @transform_3(%arg0: i32) -> (i32, i32) {
    %c0_i32 = arith.constant 0 : i32
    %c0_i32_0 = arith.constant 0 : i32
    return %arg0, %c0_i32 : i32, i32
  }
}

module attributes {stable_mosaic.version = 11 : i64} {
  func.func @_fused_mm_kernel(%arg0: i32, %arg1: memref<32x297xf32, #tpu.memory_space<vmem>>, %arg2: memref<297x64xf32, #tpu.memory_space<vmem>>, %arg3: memref<1x64xf32, #tpu.memory_space<vmem>>, %arg4: memref<32x64xf32, #tpu.memory_space<vmem>>) attributes {dimension_semantics = [#tpu.dimension_semantics<parallel>], iteration_bounds = array<i64: 1>, scalar_prefetch = 0 : i64, scratch_operands = 0 : i64, tpu.core_type = #tpu.core_type<tc>, window_params = [{transform_indices = @transform_0, window_bounds = array<i64: 32, 297>}, {pipeline_mode = #tpu.pipeline_mode<synchronous>, transform_indices = @transform_1, window_bounds = array<i64: 297, 64>}, {pipeline_mode = #tpu.pipeline_mode<synchronous>, transform_indices = @transform_2, window_bounds = array<i64: 1, 64>}, {transform_indices = @transform_3, window_bounds = array<i64: 32, 64>}]} {
    %c0 = arith.constant 0 : index
    %c0_0 = arith.constant 0 : index
    %0 = vector.load %arg1[%c0, %c0_0] : memref<32x297xf32, #tpu.memory_space<vmem>>, vector<32x297xf32>
    %c0_1 = arith.constant 0 : index
    %c0_2 = arith.constant 0 : index
    %1 = vector.load %arg2[%c0_1, %c0_2] : memref<297x64xf32, #tpu.memory_space<vmem>>, vector<297x64xf32>
    %cst = arith.constant dense<0.000000e+00> : vector<32x64xf32>
    %2 = tpu.matmul %0, %1, %cst {dimension_numbers = #tpu.dot_dimension_numbers<[1], [0], [0], [1], [0, 0, 1, 1], [], []>} : vector<32x297xf32>, vector<297x64xf32>, vector<32x64xf32> -> vector<32x64xf32>
    %c0_3 = arith.constant 0 : index
    %c0_4 = arith.constant 0 : index
    %3 = vector.load %arg3[%c0_3, %c0_4] : memref<1x64xf32, #tpu.memory_space<vmem>>, vector<1x64xf32>
    %4 = vector.broadcast %3 : vector<1x64xf32> to vector<32x64xf32>
    %5 = arith.addf %2, %4 : vector<32x64xf32>
    %cst_5 = arith.constant 0.000000e+00 : f32
    %6 = vector.broadcast %cst_5 : f32 to vector<32x64xf32>
    %7 = arith.cmpf oge, %5, %6 : vector<32x64xf32>
    %cst_6 = arith.constant 2.000000e-01 : f32
    %8 = vector.broadcast %cst_6 : f32 to vector<32x64xf32>
    %9 = arith.mulf %8, %5 : vector<32x64xf32>
    %10 = arith.select %7, %5, %9 : vector<32x64xi1>, vector<32x64xf32>
    %c0_7 = arith.constant 0 : index
    %c0_8 = arith.constant 0 : index
    %11 = vector.load %arg4[%c0_7, %c0_8] : memref<32x64xf32, #tpu.memory_space<vmem>>, vector<32x64xf32>
    tpu.vector_store %arg4[%c0_7, %c0_8], %10 {strides = array<i32>} : memref<32x64xf32, #tpu.memory_space<vmem>>, vector<32x64xf32>,
    return
  }
  func.func @transform_0(%arg0: i32) -> (i32, i32) {
    %c0_i32 = arith.constant 0 : i32
    %c0_i32_0 = arith.constant 0 : i32
    return %arg0, %c0_i32 : i32, i32
  }
  func.func @transform_1(%arg0: i32) -> (i32, i32) {
    %c0_i32 = arith.constant 0 : i32
    %c0_i32_0 = arith.constant 0 : i32
    %c0_i32_1 = arith.constant 0 : i32
    return %c0_i32, %c0_i32_0 : i32, i32
  }
  func.func @transform_2(%arg0: i32) -> (i32, i32) {
    %c0_i32 = arith.constant 0 : i32
    %c0_i32_0 = arith.constant 0 : i32
    %c0_i32_1 = arith.constant 0 : i32
    return %c0_i32, %c0_i32_0 : i32, i32
  }
  func.func @transform_3(%arg0: i32) -> (i32, i32) {
    %c0_i32 = arith.constant 0 : i32
    %c0_i32_0 = arith.constant 0 : i32
    return %arg0, %c0_i32 : i32, i32
  }
}

module attributes {stable_mosaic.version = 11 : i64} {
  func.func @_fused_mm_kernel(%arg0: i32, %arg1: memref<8x1024xf32, #tpu.memory_space<vmem>>, %arg2: memref<1024x64xf32, #tpu.memory_space<vmem>>, %arg3: memref<1x64xf32, #tpu.memory_space<vmem>>, %arg4: memref<8x64xf32, #tpu.memory_space<vmem>>) attributes {dimension_semantics = [#tpu.dimension_semantics<parallel>], iteration_bounds = array<i64: 1>, scalar_prefetch = 0 : i64, scratch_operands = 0 : i64, tpu.core_type = #tpu.core_type<tc>, window_params = [{transform_indices = @transform_0, window_bounds = array<i64: 8, 1024>}, {pipeline_mode = #tpu.pipeline_mode<synchronous>, transform_indices = @transform_1, window_bounds = array<i64: 1024, 64>}, {pipeline_mode = #tpu.pipeline_mode<synchronous>, transform_indices = @transform_2, window_bounds = array<i64: 1, 64>}, {transform_indices = @transform_3, window_bounds = array<i64: 8, 64>}]} {
    %c0 = arith.constant 0 : index
    %c0_0 = arith.constant 0 : index
    %0 = vector.load %arg1[%c0, %c0_0] : memref<8x1024xf32, #tpu.memory_space<vmem>>, vector<8x1024xf32>
    %c0_1 = arith.constant 0 : index
    %c0_2 = arith.constant 0 : index
    %1 = vector.load %arg2[%c0_1, %c0_2] : memref<1024x64xf32, #tpu.memory_space<vmem>>, vector<1024x64xf32>
    %cst = arith.constant dense<0.000000e+00> : vector<8x64xf32>
    %2 = tpu.matmul %0, %1, %cst {dimension_numbers = #tpu.dot_dimension_numbers<[1], [0], [0], [1], [0, 0, 1, 1], [], []>} : vector<8x1024xf32>, vector<1024x64xf32>, vector<8x64xf32> -> vector<8x64xf32>
    %c0_3 = arith.constant 0 : index
    %c0_4 = arith.constant 0 : index
    %3 = vector.load %arg3[%c0_3, %c0_4] : memref<1x64xf32, #tpu.memory_space<vmem>>, vector<1x64xf32>
    %4 = vector.broadcast %3 : vector<1x64xf32> to vector<8x64xf32>
    %5 = arith.addf %2, %4 : vector<8x64xf32>
    %cst_5 = arith.constant 0.000000e+00 : f32
    %6 = vector.broadcast %cst_5 : f32 to vector<8x64xf32>
    %7 = arith.cmpf oge, %5, %6 : vector<8x64xf32>
    %cst_6 = arith.constant 2.000000e-01 : f32
    %8 = vector.broadcast %cst_6 : f32 to vector<8x64xf32>
    %9 = arith.mulf %8, %5 : vector<8x64xf32>
    %10 = arith.select %7, %5, %9 : vector<8x64xi1>, vector<8x64xf32>
    %c0_7 = arith.constant 0 : index
    %c0_8 = arith.constant 0 : index
    %11 = vector.load %arg4[%c0_7, %c0_8] : memref<8x64xf32, #tpu.memory_space<vmem>>, vector<8x64xf32>
    tpu.vector_store %arg4[%c0_7, %c0_8], %10 {strides = array<i32>} : memref<8x64xf32, #tpu.memory_space<vmem>>, vector<8x64xf32>,
    return
  }
  func.func @transform_0(%arg0: i32) -> (i32, i32) {
    %c0_i32 = arith.constant 0 : i32
    %c0_i32_0 = arith.constant 0 : i32
    return %arg0, %c0_i32 : i32, i32
  }
  func.func @transform_1(%arg0: i32) -> (i32, i32) {
    %c0_i32 = arith.constant 0 : i32
    %c0_i32_0 = arith.constant 0 : i32
    %c0_i32_1 = arith.constant 0 : i32
    return %c0_i32, %c0_i32_0 : i32, i32
  }
  func.func @transform_2(%arg0: i32) -> (i32, i32) {
    %c0_i32 = arith.constant 0 : i32
    %c0_i32_0 = arith.constant 0 : i32
    %c0_i32_1 = arith.constant 0 : i32
    return %c0_i32, %c0_i32_0 : i32, i32
  }
  func.func @transform_3(%arg0: i32) -> (i32, i32) {
    %c0_i32 = arith.constant 0 : i32
    %c0_i32_0 = arith.constant 0 : i32
    return %arg0, %c0_i32 : i32, i32
  }
}

module attributes {stable_mosaic.version = 11 : i64} {
  func.func @_fused_mm_kernel(%arg0: i32, %arg1: memref<8x64xf32, #tpu.memory_space<vmem>>, %arg2: memref<64x1xf32, #tpu.memory_space<vmem>>, %arg3: memref<1x1xf32, #tpu.memory_space<vmem>>, %arg4: memref<8x1xf32, #tpu.memory_space<vmem>>) attributes {dimension_semantics = [#tpu.dimension_semantics<parallel>], iteration_bounds = array<i64: 1>, scalar_prefetch = 0 : i64, scratch_operands = 0 : i64, tpu.core_type = #tpu.core_type<tc>, window_params = [{transform_indices = @transform_0, window_bounds = array<i64: 8, 64>}, {pipeline_mode = #tpu.pipeline_mode<synchronous>, transform_indices = @transform_1, window_bounds = array<i64: 64, 1>}, {pipeline_mode = #tpu.pipeline_mode<synchronous>, transform_indices = @transform_2, window_bounds = array<i64: 1, 1>}, {transform_indices = @transform_3, window_bounds = array<i64: 8, 1>}]} {
    %c0 = arith.constant 0 : index
    %c0_0 = arith.constant 0 : index
    %0 = vector.load %arg1[%c0, %c0_0] : memref<8x64xf32, #tpu.memory_space<vmem>>, vector<8x64xf32>
    %c0_1 = arith.constant 0 : index
    %c0_2 = arith.constant 0 : index
    %1 = vector.load %arg2[%c0_1, %c0_2] : memref<64x1xf32, #tpu.memory_space<vmem>>, vector<64x1xf32>
    %cst = arith.constant dense<0.000000e+00> : vector<8x1xf32>
    %2 = tpu.matmul %0, %1, %cst {dimension_numbers = #tpu.dot_dimension_numbers<[1], [0], [0], [1], [0, 0, 1, 1], [], []>} : vector<8x64xf32>, vector<64x1xf32>, vector<8x1xf32> -> vector<8x1xf32>
    %c0_3 = arith.constant 0 : index
    %c0_4 = arith.constant 0 : index
    %3 = vector.load %arg3[%c0_3, %c0_4] : memref<1x1xf32, #tpu.memory_space<vmem>>, vector<1x1xf32>
    %4 = vector.broadcast %3 : vector<1x1xf32> to vector<8x1xf32>
    %5 = arith.addf %2, %4 : vector<8x1xf32>
    %c0_5 = arith.constant 0 : index
    %c0_6 = arith.constant 0 : index
    %6 = vector.load %arg4[%c0_5, %c0_6] : memref<8x1xf32, #tpu.memory_space<vmem>>, vector<8x1xf32>
    tpu.vector_store %arg4[%c0_5, %c0_6], %5 {strides = array<i32>} : memref<8x1xf32, #tpu.memory_space<vmem>>, vector<8x1xf32>,
    return
  }
  func.func @transform_0(%arg0: i32) -> (i32, i32) {
    %c0_i32 = arith.constant 0 : i32
    %c0_i32_0 = arith.constant 0 : i32
    return %arg0, %c0_i32 : i32, i32
  }
  func.func @transform_1(%arg0: i32) -> (i32, i32) {
    %c0_i32 = arith.constant 0 : i32
    %c0_i32_0 = arith.constant 0 : i32
    %c0_i32_1 = arith.constant 0 : i32
    return %c0_i32, %c0_i32_0 : i32, i32
  }
  func.func @transform_2(%arg0: i32) -> (i32, i32) {
    %c0_i32 = arith.constant 0 : i32
    %c0_i32_0 = arith.constant 0 : i32
    %c0_i32_1 = arith.constant 0 : i32
    return %c0_i32, %c0_i32_0 : i32, i32
  }
  func.func @transform_3(%arg0: i32) -> (i32, i32) {
    %c0_i32 = arith.constant 0 : i32
    %c0_i32_0 = arith.constant 0 : i32
    return %arg0, %c0_i32 : i32, i32
  }
}

</mosaic_0001>

<bundles_post_ra>
// kernel: discriminator_forward.6
= control target key start
LH: loop header
LB: loop body
LE: loop exit
PB: predicated region body
PF: predicated region fallthrough
CT: control target
= control target key end

     0   :  { %vm26_vm0 = vcmask 261120   ;;  %s181_s0 = inlined_call_operand.vmem [shape: f32[32,32], index: 0, kind: input, shape index: {}]   ;;  %s182_s1 = inlined_call_operand.hbm [shape: f32[1,1], index: 1, kind: output, shape index: {}]  }
   0x1   :  { %v9_v0 = vld [vmem:[%s181_s0] sm:$0xff]  ;;  %v10_v1 = vld [vmem:[%s181_s0 + $0x8] sm:$0xff]  ;;  %v11_v2 = vld [vmem:[%s181_s0 + $0x10] sm:$0xff] }
   0x2   :  { %v12_v3 = vld [vmem:[%s181_s0 + $0x18] sm:$0xff]  ;;  %v27_v4 = vsel %vm26_vm0, %v9_v0, 0.0  ;;  %v28_v5 = vsel %vm26_vm0, %v10_v1, 0.0  ;;  %v30_v6 = vsel %vm26_vm0, %v11_v2, 0.0 }
   0x3   :  { %6 = vsyncpa [#allocation3], 0  ;;  %v29_v7 = vadd.f32 %v28_v5, %v27_v4  ;;  %v32_v8 = vsel %vm26_vm0, %v12_v3, 0.0  ;;  %s138_s18 = smov [#allocation2]   ;;  %vm89_vm3 = vcmask 0  }
   0x4   :  { %s97_s19 = sshll.u32 %s138_s18, 4  ;;  %s98_s19 = int_to_ptr.vmem [resolvable:$true] %s97_s19 }
   0x5   :  { %v31_v9 = vadd.f32 %v30_v6, %v29_v7  ;;  %s114_s21 = scalar_lea.vmem %s98_s19, 16  ;;  %s118_s22 = scalar_lea.vmem %s98_s19, 32 }
   0x6   :  { %p115_p0 = scmp.ne.s32.totalorder %s98_s19, %s114_s21  ;;  %p119_p1 = scmp.lt.s32.totalorder %s98_s19, %s98_s19 }
   0x7   :  { %v33_v10 = vadd.f32 %v32_v8, %v31_v9  ;;  %p120_p2 = scmp.lt.s32.totalorder %s118_s22, %s114_s21 }
   0x9   :  { %34 = vadd.xlane.f32.xlu0 %v33_v10  ;;  %p121_p3 = por %p120_p2, %p119_p1 }
   0xb   :  { %p122_p4 = pnand %p121_p3, %p115_p0 }
  0x96   :  { %v35_v11 = vpop.xlane.xlu0 %34 }
  0x97   :  { %v36_v12 = vrot.slane %v35_v11, 4 }
  0x99   :  { %v37_v13 = vadd.f32 %v36_v12, %v35_v11 }
  0x9b   :  { %v38_v14 = vrot.slane %v37_v13, 2 }
  0x9d   :  { %v39_v15 = vadd.f32 %v38_v14, %v37_v13 }
  0x9f   :  { %v40_v16 = vrot.slane %v39_v15, 1 }
  0xa1   :  { %v41_v17 = vadd.f32 %v40_v16, %v39_v15 }
  0xa3   :  { %105 = vpush %v41_v17 }
  0xd4   :  { %s106_s0 = spop %105 }
  0xd5   :  { %s45_s14 = smul.f32 0.0009765625, %s106_s0 }
  0xd7   :  { %v46_v18 = vstv %s45_s14 }
  0xd8   :  { %v47_v19 = vsub.f32 %v9_v0, %v46_v18  ;;  %v48_v20 = vsub.f32 %v10_v1, %v46_v18  ;;  %v49_v21 = vsub.f32 %v11_v2, %v46_v18  ;;  %v50_v22 = vsub.f32 %v12_v3, %v46_v18 }
  0xda   :  { %v51_v23 = vmul.f32 %v47_v19, %v47_v19  ;;  %v52_v24 = vmul.f32 %v48_v20, %v48_v20  ;;  %v53_v25 = vmul.f32 %v49_v21, %v49_v21  ;;  %v54_v26 = vmul.f32 %v50_v22, %v50_v22 }
  0xdc   :  { %v59_v27 = vsel %vm26_vm0, %v51_v23, 0.0  ;;  %v60_v28 = vsel %vm26_vm0, %v52_v24, 0.0  ;;  %v62_v30 = vsel %vm26_vm0, %v53_v25, 0.0  ;;  %v64_v32 = vsel %vm26_vm0, %v54_v26, 0.0 }
  0xdd   :  { %v61_v29 = vadd.f32 %v60_v28, %v59_v27 }
  0xdf   :  { %v63_v31 = vadd.f32 %v62_v30, %v61_v29 }
  0xe1   :  { %v65_v33 = vadd.f32 %v64_v32, %v63_v31 }
  0xe3   :  { %66 = vadd.xlane.f32.xlu0 %v65_v33 }
 0x170   :  { %v67_v34 = vpop.xlane.xlu0 %66 }
 0x171   :  { %v68_v35 = vrot.slane %v67_v34, 4 }
 0x173   :  { %v69_v36 = vadd.f32 %v68_v35, %v67_v34 }
 0x175   :  { %v70_v37 = vrot.slane %v69_v36, 2 }
 0x177   :  { %v71_v38 = vadd.f32 %v70_v37, %v69_v36 }
 0x179   :  { %v72_v39 = vrot.slane %v71_v38, 1 }
 0x17b   :  { %v73_v40 = vadd.f32 %v72_v39, %v71_v38 }
 0x17d   :  { %107 = vpush %v73_v40 }
 0x1ae   :  { %s108_s15 = spop %107 }
 0x1af   :  { %s77_s16 = smul.f32 0.0009765625, %s108_s15 }
 0x1b1   :  { %s78_s17 = sadd.f32 1e-08, %s77_s16 }
 0x1b3   :  { %v79_v41 = vstv %s78_s17 }
 0x1b4   :  { %112 = vrsqrt.f32 %v79_v41  ;;  %vm82_vm1 = vcmp.eq.f32.partialorder %v79_v41, inf  ;;  %v85_v44 = vand.u32 2147483648, %v79_v41  ;;  %vm84_vm2 = vcmp.eq.f32.partialorder %v79_v41, 0.0 }
 0x1be   :  { %v113_v42 = vpop.eup %112 }
 0x1bf   :  { %v81_v43 = vmul.f32 %v113_v42, %v79_v41 }
 0x1c1   :  { %v83_v45 = vsel %vm82_vm1, %v79_v41, %v81_v43 }
 0x1c2   :  { %v86_v46 = vsel %vm84_vm2, %v85_v44, %v83_v45 }
 0x1c3   :  { %109 = vpush %v86_v46 }
 0x1f4   :  { %s110_s20 = spop %109 }
 0x1f5   :  { %v88_v47 = vstv %s110_s20 }
 0x1f6   :  { %90 = vst.msk [vmem:[#allocation2] sm:$0x1] %vm89_vm3, %v88_v47 }
 0x1f7   :  { %125 = shalt.err (!%p122_p4)
}
 0x1f8   :  { %s126_s25 = scalar_lea.hbm %s182_s1, 16 }
 0x1f9   :  { %p127_p5 = scmp.ne.s32.totalorder %s182_s1, %s126_s25  ;;  %p130_p6 = scmp.lt.u32.totalorder %s126_s25, %s182_s1 }
 0x1fb   :  { %p132_p7 = pnand %p130_p6, %p127_p5 }
 0x1fd   :  { %135 = shalt.err (!%p132_p7)
}
 0x1fe   :  { %100 = dma.vmem_to_hbm [thread:$0]  %s98_s19, 16, %s182_s1, [#allocation3]  }
 0x1ff   :  { %136 = dma.done.wait [#allocation3], 16  }
 0x200   :  { %137 = vsyncadd [#allocation3], 4294967280 }
 0x201   :  { %104 = vsyncpa [#allocation3], 1 }

// kernel: discriminator_forward.5
= control target key start
LH: loop header
LB: loop body
LE: loop exit
PB: predicated region body
PF: predicated region fallthrough
CT: control target
= control target key end

     0   :  { %vm42_vm0 = vcmask 1042432   ;;  %vm29_vm1 = vcmask 220160   ;;  %vm183_vm2 = vmmov 1   ;;  %vm131_vm4 = vcmask 261120   ;;  %s247_s1 = inlined_call_operand.vmem [shape: f32[27,32], index: 1, kind: input, shape index: {}]   ;;  %s248_s0 = inlined_call_operand.vmem [shape: f32[32,27], index: 0, kind: input, shape index: {}]   ;;  %s249_s2 = inlined_call_operand.vmem [shape: f32[1,32], index: 2, kind: input, shape index: {}]   ;;  %s250_s3 = inlined_call_operand.vmem [shape: f32[32,32], index: 3, kind: output, shape index: {}]  }
   0x1   :  { %v18_v0 = vld [vmem:[%s247_s1] sm:$0xff]  ;;  %v19_v1 = vld [vmem:[%s247_s1 + $0x8] sm:$0xff]  ;;  %v20_v2 = vld [vmem:[%s247_s1 + $0x10] sm:$0xff] }
   0x2   :  { %v168_v3 = vpack.c.bf16 %v19_v1, %v18_v0  ;;  %v21_v4 = vld [vmem:[%s247_s1 + $0x18] sm:$0x7]  ;;  %v14_v5 = vld [vmem:[%s248_s0] sm:$0xff]  ;;  %vm173_vm3 = vmpackc.low %vm42_vm0, %vm183_vm2 }
   0x3   :  { %v172_v6 = vpack.c.bf16 %v21_v4, %v20_v2  ;;  %162 = vmatprep.mubr.msk.f32.mxu0 %vm29_vm1, %v14_v5  ;;  %v16_v7 = vld [vmem:[%s248_s0 + $0x10] sm:$0xff]  ;;  %v15_v8 = vld [vmem:[%s248_s0 + $0x8] sm:$0xff]  ;;  %v17_v9 = vld [vmem:[%s248_s0 + $0x18] sm:$0xff] }
   0x4   :  { %169 = vmatprep.subr.bf16.mxu0 %v168_v3  ;;  %178 = vmatprep.subr.bf16.mxu1 %v168_v3  ;;  %v140_v10 = vld [vmem:[%s249_s2] ss:$0 sm:$0xff] }
   0x5   :  { %171 = vmatpush3.bf16.msra.mxu0 %v168_v3  ;;  %180 = vmatpush3.bf16.msra.mxu1 %v168_v3 }
   0x6   :  { %174 = vmatprep.subr.msk.bf16.mxu0 %vm173_vm3, %v172_v6  ;;  %179 = vmatprep.subr.msk.bf16.mxu1 %vm173_vm3, %v172_v6 }
   0x7   :  { %165 = vmatprep.mubr.msk.f32.mxu1 %vm29_vm1, %v16_v7 }
   0x9   :  { %177 = vmatpush3.bf16.msk.msra.mxu0 %vm173_vm3, %v172_v6  ;;  %181 = vmatpush3.bf16.msk.msra.mxu1 %vm173_vm3, %v172_v6 }
   0xc   :  { %163 = vmatmul.mubr.msk.f32.vlgmr.msra.gmra.mrb[0].mxu0 %vm29_vm1, %v15_v8  ;;  %166 = vmatmul.mubr.msk.f32.vlgmr.msra.gmra.mrb[0].mxu1 %vm29_vm1, %v17_v9 }
  0xdf   :  { %v164_v11 = vpop.f32.mrb[0].mxu0  ;;  %v167_v12 = vpop.f32.mrb[0].mxu1 }
  0xe0   :  { %v118_v13 = vadd.f32 %v164_v11, %v140_v10  ;;  %v128_v14 = vadd.f32 %v167_v12, %v140_v10  ;;  %v112_v15 = vpop.f32.mrb[1].mxu0  ;;  %v122_v16 = vpop.f32.mrb[1].mxu1 }
  0xe1   :  { %v113_v17 = vadd.f32 %v140_v10, %v112_v15  ;;  %v123_v18 = vadd.f32 %v140_v10, %v122_v16 }
  0xe2   :  { %133 = vst.msk [vmem:[%s250_s3 + $0x8] sm:$0xff] %vm131_vm4, %v118_v13  ;;  %135 = vst.msk [vmem:[%s250_s3 + $0x18] sm:$0xff] %vm131_vm4, %v128_v14 }
  0xe3   :  { %132 = vst.msk [vmem:[%s250_s3] sm:$0xff] %vm131_vm4, %v113_v17  ;;  %134 = vst.msk [vmem:[%s250_s3 + $0x10] sm:$0xff] %vm131_vm4, %v123_v18 }

// kernel: discriminator_forward.7
= control target key start
LH: loop header
LB: loop body
LE: loop exit
PB: predicated region body
PF: predicated region fallthrough
CT: control target
= control target key end

     0   :  { %vm84_vm0 = vcmask 1040384   ;;  %vm71_vm1 = vcmask 334848   ;;  %vm404_vm2 = vmmov 1   ;;  %vm270_vm4 = vcmask 523264   ;;  %s607_s1 = inlined_call_operand.vmem [shape: f32[297,64], index: 1, kind: input, shape index: {}]   ;;  %s608_s0 = inlined_call_operand.vmem [shape: f32[32,297], index: 0, kind: input, shape index: {}]   ;;  %s609_s2 = inlined_call_operand.vmem [shape: f32[1,64], index: 2, kind: input, shape index: {}]   ;;  %s610_s3 = inlined_call_operand.vmem [shape: f32[32,64], index: 3, kind: output, shape index: {}]  }
   0x1   :  { %v42_v0 = vld [vmem:[%s607_s1 + $0x80] sm:$0xff]  ;;  %v43_v1 = vld [vmem:[%s607_s1 + $0x88] sm:$0xff]  ;;  %v44_v5 = vld [vmem:[%s607_s1 + $0x90] sm:$0xff] }
   0x2   :  { %v26_v2 = vld [vmem:[%s607_s1] sm:$0xff]  ;;  %v357_v3 = vpack.c.bf16 %v43_v1, %v42_v0  ;;  %v27_v4 = vld [vmem:[%s607_s1 + $0x8] sm:$0xff]  ;;  %v45_v6 = vld [vmem:[%s607_s1 + $0x98] sm:$0xff] }
   0x3   :  { %v359_v7 = vpack.c.bf16 %v27_v4, %v26_v2  ;;  %v361_v8 = vpack.c.bf16 %v45_v6, %v44_v5  ;;  %v28_v9 = vld [vmem:[%s607_s1 + $0x10] sm:$0xff]  ;;  %v29_v10 = vld [vmem:[%s607_s1 + $0x18] sm:$0xff]  ;;  %v46_v11 = vld [vmem:[%s607_s1 + $0xa0] sm:$0xff] }
   0x4   :  { %358 = vmatprep.subr.bf16.mxu0 %v357_v3  ;;  %v47_v12 = vld [vmem:[%s607_s1 + $0xa8] sm:$0xff]  ;;  %v363_v13 = vpack.c.bf16 %v29_v10, %v28_v9  ;;  %v30_v15 = vld [vmem:[%s607_s1 + $0x20] sm:$0xff]  ;;  %v48_v17 = vld [vmem:[%s607_s1 + $0xb0] sm:$0xff] }
   0x5   :  { %360 = vmatpush3.bf16.msra.mxu0 %v359_v7  ;;  %v365_v14 = vpack.c.bf16 %v47_v12, %v46_v11  ;;  %v31_v16 = vld [vmem:[%s607_s1 + $0x28] sm:$0xff]  ;;  %v49_v18 = vld [vmem:[%s607_s1 + $0xb8] sm:$0xff]  ;;  %v58_v20 = vld [vmem:[%s607_s1 + $0x100] sm:$0xff] }
   0x6   :  { %362 = vmatprep.subr.bf16.mxu0 %v361_v8  ;;  %v367_v19 = vpack.c.bf16 %v31_v16, %v30_v15  ;;  %v369_v21 = vpack.c.bf16 %v49_v18, %v48_v17  ;;  %v32_v22 = vld [vmem:[%s607_s1 + $0x30] sm:$0xff]  ;;  %v33_v23 = vld [vmem:[%s607_s1 + $0x38] sm:$0xff]  ;;  %v59_v24 = vld [vmem:[%s607_s1 + $0x108] sm:$0xff] }
   0x7   :  { %v50_v25 = vld [vmem:[%s607_s1 + $0xc0] sm:$0xff]  ;;  %v51_v26 = vld [vmem:[%s607_s1 + $0xc8] sm:$0xff]  ;;  %v389_v27 = vpack.c.bf16 %v59_v24, %v58_v20  ;;  %v60_v28 = vld [vmem:[%s607_s1 + $0x110] sm:$0xff]  ;;  %v371_v30 = vpack.c.bf16 %v33_v23, %v32_v22 }
   0x8   :  { %v61_v29 = vld [vmem:[%s607_s1 + $0x118] sm:$0xff]  ;;  %v15_v32 = vld [vmem:[%s608_s0 + $0x8] sm:$0xff]  ;;  %v62_v33 = vld [vmem:[%s607_s1 + $0x120] sm:$0xff]  ;;  %v373_v34 = vpack.c.bf16 %v51_v26, %v50_v25 }
   0x9   :  { %364 = vmatpush3.bf16.msra.mxu0 %v363_v13  ;;  %390 = vmatprep.subr.bf16.mxu1 %v389_v27  ;;  %v393_v31 = vpack.c.bf16 %v61_v29, %v60_v28  ;;  %v34_v35 = vld [vmem:[%s607_s1 + $0x40] sm:$0xff]  ;;  %v35_v36 = vld [vmem:[%s607_s1 + $0x48] sm:$0xff]  ;;  %v52_v38 = vld [vmem:[%s607_s1 + $0xd0] sm:$0xff] }
   0xa   :  { %366 = vmatprep.subr.bf16.mxu0 %v365_v14  ;;  %392 = vmatpush3.bf16.msra.mxu1 %v389_v27  ;;  %v63_v37 = vld [vmem:[%s607_s1 + $0x128] sm:$0x1]  ;;  %v53_v39 = vld [vmem:[%s607_s1 + $0xd8] sm:$0xff]  ;;  %v16_v41 = vld [vmem:[%s608_s0 + $0x10] sm:$0xff]  ;;  %v375_v43 = vpack.c.bf16 %v35_v36, %v34_v35 }
   0xb   :  { %394 = vmatprep.subr.bf16.mxu1 %v393_v31  ;;  %152 = vmatprep.mubr.f32.mxu0 %v15_v32  ;;  %v397_v40 = vpack.c.bf16 %v63_v37, %v62_v33  ;;  %vm516_vm3 = vmpackc.low %vm84_vm0, %vm404_vm2  ;;  %v377_v44 = vpack.c.bf16 %v53_v39, %v52_v38  ;;  %v36_v45 = vld [vmem:[%s607_s1 + $0x50] sm:$0xff]  ;;  %v37_v46 = vld [vmem:[%s607_s1 + $0x58] sm:$0xff] }
   0xc   :  { %351 = vmatprep.mubr.msk.f32.mxu1 %vm71_vm1, %v16_v41  ;;  %v54_v47 = vld [vmem:[%s607_s1 + $0xe0] sm:$0xff]  ;;  %v55_v48 = vld [vmem:[%s607_s1 + $0xe8] sm:$0xff]  ;;  %v379_v49 = vpack.c.bf16 %v37_v46, %v36_v45  ;;  %v56_v54 = vld [vmem:[%s607_s1 + $0xf0] sm:$0xff] }
   0xd   :  { %368 = vmatpush3.bf16.msra.mxu0 %v367_v19  ;;  %v381_v50 = vpack.c.bf16 %v55_v48, %v54_v47  ;;  %v38_v51 = vld [vmem:[%s607_s1 + $0x60] sm:$0xff]  ;;  %v39_v52 = vld [vmem:[%s607_s1 + $0x68] sm:$0xff]  ;;  %v57_v55 = vld [vmem:[%s607_s1 + $0xf8] sm:$0xff] }
   0xe   :  { %370 = vmatprep.subr.bf16.mxu0 %v369_v21  ;;  %396 = vmatpush3.bf16.msra.mxu1 %v393_v31  ;;  %v19_v53 = vld [vmem:[%s608_s0 + $0x28] sm:$0xff]  ;;  %v22_v56 = vld [vmem:[%s608_s0 + $0x40] sm:$0xff]  ;;  %v383_v57 = vpack.c.bf16 %v39_v52, %v38_v51  ;;  %v385_v58 = vpack.c.bf16 %v57_v55, %v56_v54  ;;  %v40_v59 = vld [vmem:[%s607_s1 + $0x70] sm:$0xff] }
   0xf   :  { %399 = vmatprep.subr.msk.bf16.mxu1 %vm516_vm3, %v397_v40  ;;  %v41_v60 = vld [vmem:[%s607_s1 + $0x78] sm:$0xff]  ;;  %v14_v63 = vld [vmem:[%s608_s0] sm:$0xff]  ;;  %v20_v3 = vld [vmem:[%s608_s0 + $0x30] sm:$0xff] }
  0x10   :  { %v25_v61 = vld [vmem:[%s608_s0 + $0x58] sm:$0xff]  ;;  %v387_v62 = vpack.c.bf16 %v41_v60, %v40_v59  ;;  %v18_v0 = vld [vmem:[%s608_s0 + $0x20] sm:$0xff]  ;;  %v24_v4 = vld [vmem:[%s608_s0 + $0x50] sm:$0xff] }
  0x11   :  { %372 = vmatpush3.bf16.msra.mxu0 %v371_v30  ;;  %v17_v1 = vld [vmem:[%s608_s0 + $0x18] sm:$0xff]  ;;  %v23_v5 = vld [vmem:[%s608_s0 + $0x48] sm:$0xff]  ;;  %v279_v12 = vld [vmem:[%s609_s2] ss:$0 sm:$0xff] }
  0x12   :  { %374 = vmatprep.subr.bf16.mxu0 %v373_v34  ;;  %402 = vmatpush3.bf16.msk.msra.mxu1 %vm516_vm3, %v397_v40  ;;  %v21_v2 = vld [vmem:[%s608_s0 + $0x38] sm:$0xff] }
  0x15   :  { %376 = vmatpush3.bf16.msra.mxu0 %v375_v43  ;;  %352 = vmatmul.mubr.msk.f32.vlgmr.msra.gmra.mrb[0].mxu1 %vm71_vm1, %v19_v53 }
  0x16   :  { %378 = vmatprep.subr.bf16.mxu0 %v377_v44  ;;  %354 = vmatprep.mubr.msk.f32.mxu1 %vm71_vm1, %v22_v56 }
  0x19   :  { %380 = vmatpush3.bf16.msra.mxu0 %v379_v49  ;;  %355 = vmatmul.mubr.msk.f32.gmra.mrb[2].mxu1 %vm71_vm1, %v25_v61 }
  0x1a   :  { %382 = vmatprep.subr.bf16.mxu0 %v381_v50 }
  0x1d   :  { %384 = vmatpush3.bf16.msra.mxu0 %v383_v57 }
  0x1e   :  { %386 = vmatprep.subr.bf16.mxu0 %v385_v58 }
  0x21   :  { %388 = vmatpush3.bf16.msra.mxu0 %v387_v62 }
  0x24   :  { %153 = vmatmul.mubr.f32.vlgmr.msra.gmra.mrb[0].mxu0 %v14_v63 }
  0x25   :  { %157 = vmatprep.mubr.f32.mxu0 %v18_v0 }
  0x28   :  { %158 = vmatmul.mubr.f32.gmra.mrb[2].mxu0 %v17_v1 }
  0x29   :  { %162 = vmatprep.mubr.f32.mxu0 %v21_v2 }
  0x2c   :  { %163 = vmatmul.mubr.f32.gmra.mrb[4].mxu0 %v20_v3 }
  0x2d   :  { %167 = vmatprep.mubr.f32.mxu0 %v24_v4 }
  0x30   :  { %168 = vmatmul.mubr.f32.gmra.mrb[6].mxu0 %v23_v5 }
  0xe8   :  { %v353_v6 = vpop.f32.mrb[0].mxu1 }
  0xe9   :  { %v239_v7 = vpop.f32.mrb[1].mxu1 }
  0xec   :  { %v356_v8 = vpop.f32.mrb[2].mxu1 }
  0xed   :  { %v249_v9 = vpop.f32.mrb[3].mxu1 }
  0xf7   :  { %v317_v10 = vpop.f32.mrb[0].mxu0 }
  0xf8   :  { %v318_v11 = vpop.f32.mrb[1].mxu0 }
  0xf9   :  { %v319_v13 = vadd.f32 %v318_v11, %v317_v10 }
  0xfb   :  { %v320_v14 = vpop.f32.mrb[2].mxu0  ;;  %v155_v15 = vadd.f32 %v319_v13, %v279_v12 }
  0xfc   :  { %v321_v16 = vpop.f32.mrb[3].mxu0 }
  0xfd   :  { %v322_v17 = vadd.f32 %v321_v16, %v320_v14  ;;  %v240_v18 = vadd.f32 %v239_v7, %v155_v15 }
  0xff   :  { %v160_v19 = vadd.f32 %v322_v17, %v279_v12  ;;  %vm258_vm5 = vcmp.ge.f32.partialorder %v240_v18, 0.0  ;;  %v262_v20 = vmul.f32 0.2, %v240_v18  ;;  %v323_v21 = vpop.f32.mrb[4].mxu0 }
 0x100   :  { %v324_v22 = vpop.f32.mrb[5].mxu0 }
 0x101   :  { %v245_v23 = vadd.f32 %v353_v6, %v160_v19  ;;  %v266_v24 = vsel %vm258_vm5, %v240_v18, %v262_v20  ;;  %v325_v25 = vadd.f32 %v324_v22, %v323_v21 }
 0x102   :  { %271 = vst.msk [vmem:[%s610_s3] sm:$0xff] %vm270_vm4, %v266_v24 }
 0x103   :  { %vm259_vm6 = vcmp.ge.f32.partialorder %v245_v23, 0.0  ;;  %v263_v26 = vmul.f32 0.2, %v245_v23  ;;  %v326_v27 = vpop.f32.mrb[6].mxu0  ;;  %v165_v28 = vadd.f32 %v325_v25, %v279_v12 }
 0x104   :  { %v327_v29 = vpop.f32.mrb[7].mxu0 }
 0x105   :  { %v267_v30 = vsel %vm259_vm6, %v245_v23, %v263_v26  ;;  %v328_v31 = vadd.f32 %v327_v29, %v326_v27  ;;  %v250_v32 = vadd.f32 %v249_v9, %v165_v28 }
 0x106   :  { %272 = vst.msk [vmem:[%s610_s3 + $0x8] sm:$0xff] %vm270_vm4, %v267_v30 }
 0x107   :  { %v170_v33 = vadd.f32 %v328_v31, %v279_v12  ;;  %vm260_vm7 = vcmp.ge.f32.partialorder %v250_v32, 0.0  ;;  %v264_v34 = vmul.f32 0.2, %v250_v32 }
 0x109   :  { %v255_v35 = vadd.f32 %v356_v8, %v170_v33  ;;  %v268_v36 = vsel %vm260_vm7, %v250_v32, %v264_v34 }
 0x10a   :  { %273 = vst.msk [vmem:[%s610_s3 + $0x10] sm:$0xff] %vm270_vm4, %v268_v36 }
 0x10b   :  { %vm261_vm8 = vcmp.ge.f32.partialorder %v255_v35, 0.0  ;;  %v265_v37 = vmul.f32 0.2, %v255_v35 }
 0x10d   :  { %v269_v38 = vsel %vm261_vm8, %v255_v35, %v265_v37 }
 0x10e   :  { %274 = vst.msk [vmem:[%s610_s3 + $0x18] sm:$0xff] %vm270_vm4, %v269_v38 }

// kernel: discriminator_forward.8
= control target key start
LH: loop header
LB: loop body
LE: loop exit
PB: predicated region body
PF: predicated region fallthrough
CT: control target
= control target key end

     0   :  { %vm440_vm1 = vcmask 523264   ;;  %s1149_s1 = inlined_call_operand.vmem [shape: f32[1024,64], index: 1, kind: input, shape index: {}]   ;;  %s1150_s0 = inlined_call_operand.vmem [shape: f32[8,1024], index: 0, kind: input, shape index: {}]   ;;  %s1151_s2 = inlined_call_operand.vmem [shape: f32[1,64], index: 2, kind: input, shape index: {}]   ;;  %s1152_s3 = inlined_call_operand.vmem [shape: f32[8,64], index: 3, kind: output, shape index: {}]  }
   0x1   :  { %v38_v0 = vld [vmem:[%s1149_s1 + $0x80] sm:$0xff]  ;;  %v39_v1 = vld [vmem:[%s1149_s1 + $0x88] sm:$0xff]  ;;  %v40_v11 = vld [vmem:[%s1149_s1 + $0x90] sm:$0xff] }
   0x2   :  { %v22_v2 = vld [vmem:[%s1149_s1] sm:$0xff]  ;;  %v587_v3 = vpack.c.bf16 %v39_v1, %v38_v0  ;;  %v23_v4 = vld [vmem:[%s1149_s1 + $0x8] sm:$0xff]  ;;  %v41_v13 = vld [vmem:[%s1149_s1 + $0x98] sm:$0xff] }
   0x3   :  { %v70_v5 = vld [vmem:[%s1149_s1 + $0x180] sm:$0xff]  ;;  %v71_v6 = vld [vmem:[%s1149_s1 + $0x188] sm:$0xff]  ;;  %v589_v7 = vpack.c.bf16 %v23_v4, %v22_v2  ;;  %v24_v14 = vld [vmem:[%s1149_s1 + $0x10] sm:$0xff]  ;;  %v591_v16 = vpack.c.bf16 %v41_v13, %v40_v11 }
   0x4   :  { %v619_v8 = vpack.c.bf16 %v71_v6, %v70_v5  ;;  %v54_v9 = vld [vmem:[%s1149_s1 + $0x100] sm:$0xff]  ;;  %v55_v10 = vld [vmem:[%s1149_s1 + $0x108] sm:$0xff]  ;;  %588 = vmatprep.subr.bf16.mxu0 %v587_v3  ;;  %v25_v15 = vld [vmem:[%s1149_s1 + $0x18] sm:$0xff] }
   0x5   :  { %v621_v12 = vpack.c.bf16 %v55_v10, %v54_v9  ;;  %590 = vmatpush3.bf16.msra.mxu0 %v589_v7  ;;  %v593_v17 = vpack.c.bf16 %v25_v15, %v24_v14  ;;  %v72_v18 = vld [vmem:[%s1149_s1 + $0x190] sm:$0xff]  ;;  %v73_v19 = vld [vmem:[%s1149_s1 + $0x198] sm:$0xff]  ;;  %v42_v23 = vld [vmem:[%s1149_s1 + $0xa0] sm:$0xff] }
   0x6   :  { %620 = vmatprep.subr.bf16.mxu1 %v619_v8  ;;  %v56_v20 = vld [vmem:[%s1149_s1 + $0x110] sm:$0xff]  ;;  %v623_v21 = vpack.c.bf16 %v73_v19, %v72_v18  ;;  %v57_v22 = vld [vmem:[%s1149_s1 + $0x118] sm:$0xff]  ;;  %v43_v24 = vld [vmem:[%s1149_s1 + $0xa8] sm:$0xff]  ;;  %592 = vmatprep.subr.bf16.mxu0 %v591_v16 }
   0x7   :  { %622 = vmatpush3.bf16.msra.mxu1 %v621_v12  ;;  %v625_v25 = vpack.c.bf16 %v57_v22, %v56_v20  ;;  %v595_v26 = vpack.c.bf16 %v43_v24, %v42_v23  ;;  %v26_v27 = vld [vmem:[%s1149_s1 + $0x20] sm:$0xff]  ;;  %v27_v28 = vld [vmem:[%s1149_s1 + $0x28] sm:$0xff]  ;;  %v44_v35 = vld [vmem:[%s1149_s1 + $0xb0] sm:$0xff] }
   0x8   :  { %v74_v29 = vld [vmem:[%s1149_s1 + $0x1a0] sm:$0xff]  ;;  %624 = vmatprep.subr.bf16.mxu1 %v623_v21  ;;  %v75_v30 = vld [vmem:[%s1149_s1 + $0x1a8] sm:$0xff]  ;;  %v597_v33 = vpack.c.bf16 %v27_v28, %v26_v27  ;;  %v45_v36 = vld [vmem:[%s1149_s1 + $0xb8] sm:$0xff] }
   0x9   :  { %v58_v31 = vld [vmem:[%s1149_s1 + $0x120] sm:$0xff]  ;;  %v59_v32 = vld [vmem:[%s1149_s1 + $0x128] sm:$0xff]  ;;  %594 = vmatpush3.bf16.msra.mxu0 %v593_v17  ;;  %v627_v34 = vpack.c.bf16 %v75_v30, %v74_v29  ;;  %v28_v37 = vld [vmem:[%s1149_s1 + $0x30] sm:$0xff]  ;;  %v599_v39 = vpack.c.bf16 %v45_v36, %v44_v35 }
   0xa   :  { %596 = vmatprep.subr.bf16.mxu0 %v595_v26  ;;  %v629_v38 = vpack.c.bf16 %v59_v32, %v58_v31  ;;  %v29_v40 = vld [vmem:[%s1149_s1 + $0x38] sm:$0xff]  ;;  %v76_v41 = vld [vmem:[%s1149_s1 + $0x1b0] sm:$0xff]  ;;  %v46_v46 = vld [vmem:[%s1149_s1 + $0xc0] sm:$0xff] }
   0xb   :  { %626 = vmatpush3.bf16.msra.mxu1 %v625_v25  ;;  %v77_v42 = vld [vmem:[%s1149_s1 + $0x1b8] sm:$0xff]  ;;  %v60_v44 = vld [vmem:[%s1149_s1 + $0x130] sm:$0xff]  ;;  %v47_v47 = vld [vmem:[%s1149_s1 + $0xc8] sm:$0xff]  ;;  %v601_v48 = vpack.c.bf16 %v29_v40, %v28_v37 }
   0xc   :  { %628 = vmatprep.subr.bf16.mxu1 %v627_v34  ;;  %v631_v43 = vpack.c.bf16 %v77_v42, %v76_v41  ;;  %v61_v45 = vld [vmem:[%s1149_s1 + $0x138] sm:$0xff]  ;;  %v78_v49 = vld [vmem:[%s1149_s1 + $0x1c0] sm:$0xff]  ;;  %v79_v50 = vld [vmem:[%s1149_s1 + $0x1c8] sm:$0xff]  ;;  %v603_v52 = vpack.c.bf16 %v47_v47, %v46_v46 }
   0xd   :  { %598 = vmatpush3.bf16.msra.mxu0 %v597_v33  ;;  %v633_v51 = vpack.c.bf16 %v61_v45, %v60_v44  ;;  %v30_v53 = vld [vmem:[%s1149_s1 + $0x40] sm:$0xff]  ;;  %v31_v54 = vld [vmem:[%s1149_s1 + $0x48] sm:$0xff]  ;;  %v635_v56 = vpack.c.bf16 %v79_v50, %v78_v49  ;;  %v48_v58 = vld [vmem:[%s1149_s1 + $0xd0] sm:$0xff] }
   0xe   :  { %600 = vmatprep.subr.bf16.mxu0 %v599_v39  ;;  %v62_v55 = vld [vmem:[%s1149_s1 + $0x140] sm:$0xff]  ;;  %v63_v57 = vld [vmem:[%s1149_s1 + $0x148] sm:$0xff]  ;;  %v49_v59 = vld [vmem:[%s1149_s1 + $0xd8] sm:$0xff]  ;;  %v605_v62 = vpack.c.bf16 %v31_v54, %v30_v53 }
   0xf   :  { %630 = vmatpush3.bf16.msra.mxu1 %v629_v38  ;;  %v80_v60 = vld [vmem:[%s1149_s1 + $0x1d0] sm:$0xff]  ;;  %v81_v61 = vld [vmem:[%s1149_s1 + $0x1d8] sm:$0xff]  ;;  %v637_v63 = vpack.c.bf16 %v63_v57, %v62_v55  ;;  %v607_v0 = vpack.c.bf16 %v49_v59, %v48_v58  ;;  %v50_v6 = vld [vmem:[%s1149_s1 + $0xe0] sm:$0xff] }
  0x10   :  { %632 = vmatprep.subr.bf16.mxu1 %v631_v43  ;;  %v32_v1 = vld [vmem:[%s1149_s1 + $0x50] sm:$0xff]  ;;  %v33_v2 = vld [vmem:[%s1149_s1 + $0x58] sm:$0xff]  ;;  %v639_v4 = vpack.c.bf16 %v81_v61, %v80_v60  ;;  %v51_v7 = vld [vmem:[%s1149_s1 + $0xe8] sm:$0xff] }
  0x11   :  { %602 = vmatpush3.bf16.msra.mxu0 %v601_v48  ;;  %v64_v3 = vld [vmem:[%s1149_s1 + $0x150] sm:$0xff]  ;;  %v65_v5 = vld [vmem:[%s1149_s1 + $0x158] sm:$0xff]  ;;  %v82_v8 = vld [vmem:[%s1149_s1 + $0x1e0] sm:$0xff]  ;;  %v609_v10 = vpack.c.bf16 %v33_v2, %v32_v1  ;;  %v611_v14 = vpack.c.bf16 %v51_v7, %v50_v6 }
  0x12   :  { %604 = vmatprep.subr.bf16.mxu0 %v603_v52  ;;  %v83_v9 = vld [vmem:[%s1149_s1 + $0x1e8] sm:$0xff]  ;;  %v34_v11 = vld [vmem:[%s1149_s1 + $0x60] sm:$0xff]  ;;  %v641_v13 = vpack.c.bf16 %v65_v5, %v64_v3  ;;  %v52_v19 = vld [vmem:[%s1149_s1 + $0xf0] sm:$0xff] }
  0x13   :  { %634 = vmatpush3.bf16.msra.mxu1 %v633_v51  ;;  %v35_v12 = vld [vmem:[%s1149_s1 + $0x68] sm:$0xff]  ;;  %v66_v15 = vld [vmem:[%s1149_s1 + $0x160] sm:$0xff]  ;;  %v643_v18 = vpack.c.bf16 %v83_v9, %v82_v8  ;;  %v53_v20 = vld [vmem:[%s1149_s1 + $0xf8] sm:$0xff] }
  0x14   :  { %636 = vmatprep.subr.bf16.mxu1 %v635_v56  ;;  %v67_v16 = vld [vmem:[%s1149_s1 + $0x168] sm:$0xff]  ;;  %v17_v21 = vld [vmem:[%s1150_s0 + $0x18] sm:$0xff]  ;;  %v84_v22 = vld [vmem:[%s1149_s1 + $0x1f0] sm:$0xff]  ;;  %v613_v24 = vpack.c.bf16 %v35_v12, %v34_v11  ;;  %v615_v26 = vpack.c.bf16 %v53_v20, %v52_v19 }
  0x15   :  { %606 = vmatpush3.bf16.msra.mxu0 %v605_v62  ;;  %v15_v17 = vld [vmem:[%s1150_s0 + $0x8] sm:$0xff]  ;;  %v85_v23 = vld [vmem:[%s1149_s1 + $0x1f8] sm:$0xff]  ;;  %291 = vmatprep.mubr.f32.mxu1 %v17_v21  ;;  %v645_v25 = vpack.c.bf16 %v67_v16, %v66_v15  ;;  %v36_v27 = vld [vmem:[%s1149_s1 + $0x70] sm:$0xff] }
  0x16   :  { %608 = vmatprep.subr.bf16.mxu0 %v607_v0  ;;  %221 = vmatprep.mubr.f32.mxu0 %v15_v17  ;;  %v37_v28 = vld [vmem:[%s1149_s1 + $0x78] sm:$0xff]  ;;  %v68_v29 = vld [vmem:[%s1149_s1 + $0x170] sm:$0xff]  ;;  %v647_v30 = vpack.c.bf16 %v85_v23, %v84_v22  ;;  %v102_v32 = vld [vmem:[%s1149_s1 + $0x280] sm:$0xff] }
  0x17   :  { %638 = vmatpush3.bf16.msra.mxu1 %v637_v63  ;;  %v69_v31 = vld [vmem:[%s1149_s1 + $0x178] sm:$0xff]  ;;  %v103_v33 = vld [vmem:[%s1149_s1 + $0x288] sm:$0xff]  ;;  %v134_v34 = vld [vmem:[%s1149_s1 + $0x380] sm:$0xff]  ;;  %v617_v36 = vpack.c.bf16 %v37_v28, %v36_v27 }
  0x18   :  { %640 = vmatprep.subr.bf16.mxu1 %v639_v4  ;;  %v135_v35 = vld [vmem:[%s1149_s1 + $0x388] sm:$0xff]  ;;  %v649_v37 = vpack.c.bf16 %v69_v31, %v68_v29  ;;  %v651_v38 = vpack.c.bf16 %v103_v33, %v102_v32  ;;  %v86_v39 = vld [vmem:[%s1149_s1 + $0x200] sm:$0xff]  ;;  %v104_v44 = vld [vmem:[%s1149_s1 + $0x290] sm:$0xff] }
  0x19   :  { %610 = vmatpush3.bf16.msra.mxu0 %v609_v10  ;;  %v87_v40 = vld [vmem:[%s1149_s1 + $0x208] sm:$0xff]  ;;  %v118_v41 = vld [vmem:[%s1149_s1 + $0x300] sm:$0xff]  ;;  %v683_v42 = vpack.c.bf16 %v135_v35, %v134_v34  ;;  %v105_v45 = vld [vmem:[%s1149_s1 + $0x298] sm:$0xff] }
  0x1a   :  { %612 = vmatprep.subr.bf16.mxu0 %v611_v14  ;;  %v119_v43 = vld [vmem:[%s1149_s1 + $0x308] sm:$0xff]  ;;  %v136_v46 = vld [vmem:[%s1149_s1 + $0x390] sm:$0xff]  ;;  %v137_v47 = vld [vmem:[%s1149_s1 + $0x398] sm:$0xff]  ;;  %v653_v49 = vpack.c.bf16 %v87_v40, %v86_v39  ;;  %v655_v52 = vpack.c.bf16 %v105_v45, %v104_v44 }
  0x1b   :  { %642 = vmatpush3.bf16.msra.mxu1 %v641_v13  ;;  %v14_v48 = vld [vmem:[%s1150_s0] sm:$0xff]  ;;  %v16_v50 = vld [vmem:[%s1150_s0 + $0x10] sm:$0xff]  ;;  %v685_v51 = vpack.c.bf16 %v119_v43, %v118_v41  ;;  %v89_v54 = vld [vmem:[%s1149_s1 + $0x218] sm:$0xff]  ;;  %v687_v56 = vpack.c.bf16 %v137_v47, %v136_v46 }
  0x1c   :  { %644 = vmatprep.subr.bf16.mxu1 %v643_v18  ;;  %v88_v53 = vld [vmem:[%s1149_s1 + $0x210] sm:$0xff]  ;;  %v121_v57 = vld [vmem:[%s1149_s1 + $0x318] sm:$0xff]  ;;  %v106_v58 = vld [vmem:[%s1149_s1 + $0x2a0] sm:$0xff] }
  0x1d   :  { %614 = vmatpush3.bf16.msra.mxu0 %v613_v24  ;;  %v120_v55 = vld [vmem:[%s1149_s1 + $0x310] sm:$0xff]  ;;  %v107_v59 = vld [vmem:[%s1149_s1 + $0x2a8] sm:$0xff]  ;;  %v138_v60 = vld [vmem:[%s1149_s1 + $0x3a0] sm:$0xff]  ;;  %v657_v62 = vpack.c.bf16 %v89_v54, %v88_v53 }
  0x1e   :  { %616 = vmatprep.subr.bf16.mxu0 %v615_v26  ;;  %v139_v61 = vld [vmem:[%s1149_s1 + $0x3a8] sm:$0xff]  ;;  %v689_v63 = vpack.c.bf16 %v121_v57, %v120_v55  ;;  %v659_v0 = vpack.c.bf16 %v107_v59, %v106_v58  ;;  %v90_v1 = vld [vmem:[%s1149_s1 + $0x220] sm:$0xff]  ;;  %v108_v6 = vld [vmem:[%s1149_s1 + $0x2b0] sm:$0xff] }
  0x1f   :  { %646 = vmatpush3.bf16.msra.mxu1 %v645_v25  ;;  %v91_v2 = vld [vmem:[%s1149_s1 + $0x228] sm:$0xff]  ;;  %v122_v3 = vld [vmem:[%s1149_s1 + $0x320] sm:$0xff]  ;;  %v691_v4 = vpack.c.bf16 %v139_v61, %v138_v60  ;;  %v109_v7 = vld [vmem:[%s1149_s1 + $0x2b8] sm:$0xff] }
  0x20   :  { %648 = vmatprep.subr.bf16.mxu1 %v647_v30  ;;  %v123_v5 = vld [vmem:[%s1149_s1 + $0x328] sm:$0xff]  ;;  %v140_v8 = vld [vmem:[%s1149_s1 + $0x3b0] sm:$0xff]  ;;  %v141_v9 = vld [vmem:[%s1149_s1 + $0x3b8] sm:$0xff]  ;;  %v661_v10 = vpack.c.bf16 %v91_v2, %v90_v1  ;;  %v663_v12 = vpack.c.bf16 %v109_v7, %v108_v6 }
  0x21   :  { %618 = vmatpush3.bf16.msra.mxu0 %v617_v36  ;;  %v693_v11 = vpack.c.bf16 %v123_v5, %v122_v3  ;;  %v92_v13 = vld [vmem:[%s1149_s1 + $0x230] sm:$0xff]  ;;  %v93_v14 = vld [vmem:[%s1149_s1 + $0x238] sm:$0xff]  ;;  %v695_v16 = vpack.c.bf16 %v141_v9, %v140_v8  ;;  %v110_v18 = vld [vmem:[%s1149_s1 + $0x2c0] sm:$0xff] }
  0x22   :  { %652 = vmatprep.subr.bf16.mxu0 %v651_v38  ;;  %v124_v15 = vld [vmem:[%s1149_s1 + $0x330] sm:$0xff]  ;;  %v125_v17 = vld [vmem:[%s1149_s1 + $0x338] sm:$0xff]  ;;  %v111_v19 = vld [vmem:[%s1149_s1 + $0x2c8] sm:$0xff]  ;;  %v665_v22 = vpack.c.bf16 %v93_v14, %v92_v13 }
  0x23   :  { %650 = vmatpush3.bf16.msra.mxu1 %v649_v37  ;;  %v142_v20 = vld [vmem:[%s1149_s1 + $0x3c0] sm:$0xff]  ;;  %v143_v21 = vld [vmem:[%s1149_s1 + $0x3c8] sm:$0xff]  ;;  %v21_v24 = vld [vmem:[%s1150_s0 + $0x38] sm:$0xff]  ;;  %v697_v25 = vpack.c.bf16 %v125_v17, %v124_v15  ;;  %v667_v26 = vpack.c.bf16 %v111_v19, %v110_v18 }
  0x24   :  { %684 = vmatprep.subr.bf16.mxu1 %v683_v42  ;;  %222 = vmatmul.mubr.f32.vlgmr.msra.gmra.mrb[0].mxu0 %v14_v48  ;;  %v19_v23 = vld [vmem:[%s1150_s0 + $0x28] sm:$0xff]  ;;  %v94_v27 = vld [vmem:[%s1149_s1 + $0x240] sm:$0xff]  ;;  %v699_v30 = vpack.c.bf16 %v143_v21, %v142_v20  ;;  %v112_v32 = vld [vmem:[%s1149_s1 + $0x2d0] sm:$0xff] }
  0x25   :  { %654 = vmatpush3.bf16.msra.mxu0 %v653_v49  ;;  %v95_v28 = vld [vmem:[%s1149_s1 + $0x248] sm:$0xff]  ;;  %v126_v29 = vld [vmem:[%s1149_s1 + $0x340] sm:$0xff]  ;;  %v113_v33 = vld [vmem:[%s1149_s1 + $0x2d8] sm:$0xff]  ;;  %361 = vmatprep.mubr.f32.mxu0 %v19_v23 }
  0x26   :  { %292 = vmatmul.mubr.f32.vlgmr.msra.gmra.mrb[0].mxu1 %v16_v50  ;;  %656 = vmatprep.subr.bf16.mxu0 %v655_v52  ;;  %v127_v31 = vld [vmem:[%s1149_s1 + $0x348] sm:$0xff]  ;;  %v144_v34 = vld [vmem:[%s1149_s1 + $0x3d0] sm:$0xff]  ;;  %v145_v35 = vld [vmem:[%s1149_s1 + $0x3d8] sm:$0xff]  ;;  %v669_v36 = vpack.c.bf16 %v95_v28, %v94_v27  ;;  %v671_v38 = vpack.c.bf16 %v113_v33, %v112_v32 }
  0x27   :  { %686 = vmatpush3.bf16.msra.mxu1 %v685_v51  ;;  %431 = vmatprep.mubr.f32.mxu1 %v21_v24  ;;  %v701_v37 = vpack.c.bf16 %v127_v31, %v126_v29  ;;  %v96_v39 = vld [vmem:[%s1149_s1 + $0x250] sm:$0xff]  ;;  %v97_v40 = vld [vmem:[%s1149_s1 + $0x258] sm:$0xff]  ;;  %v703_v42 = vpack.c.bf16 %v145_v35, %v144_v34  ;;  %v114_v44 = vld [vmem:[%s1149_s1 + $0x2e0] sm:$0xff] }
  0x28   :  { %688 = vmatprep.subr.bf16.mxu1 %v687_v56  ;;  %v128_v41 = vld [vmem:[%s1149_s1 + $0x350] sm:$0xff]  ;;  %v129_v43 = vld [vmem:[%s1149_s1 + $0x358] sm:$0xff]  ;;  %v115_v45 = vld [vmem:[%s1149_s1 + $0x2e8] sm:$0xff]  ;;  %v673_v48 = vpack.c.bf16 %v97_v40, %v96_v39 }
  0x29   :  { %658 = vmatpush3.bf16.msra.mxu0 %v657_v62  ;;  %v146_v46 = vld [vmem:[%s1149_s1 + $0x3e0] sm:$0xff]  ;;  %v147_v47 = vld [vmem:[%s1149_s1 + $0x3e8] sm:$0xff]  ;;  %v705_v49 = vpack.c.bf16 %v129_v43, %v128_v41  ;;  %v675_v50 = vpack.c.bf16 %v115_v45, %v114_v44  ;;  %v116_v56 = vld [vmem:[%s1149_s1 + $0x2f0] sm:$0xff] }
  0x2a   :  { %660 = vmatprep.subr.bf16.mxu0 %v659_v0  ;;  %v98_v51 = vld [vmem:[%s1149_s1 + $0x260] sm:$0xff]  ;;  %v99_v52 = vld [vmem:[%s1149_s1 + $0x268] sm:$0xff]  ;;  %v707_v54 = vpack.c.bf16 %v147_v47, %v146_v46  ;;  %v117_v57 = vld [vmem:[%s1149_s1 + $0x2f8] sm:$0xff] }
  0x2b   :  { %690 = vmatpush3.bf16.msra.mxu1 %v689_v63  ;;  %v130_v53 = vld [vmem:[%s1149_s1 + $0x360] sm:$0xff]  ;;  %v131_v55 = vld [vmem:[%s1149_s1 + $0x368] sm:$0xff]  ;;  %v148_v58 = vld [vmem:[%s1149_s1 + $0x3f0] sm:$0xff]  ;;  %v677_v60 = vpack.c.bf16 %v99_v52, %v98_v51  ;;  %v679_v62 = vpack.c.bf16 %v117_v57, %v116_v56 }
  0x2c   :  { %692 = vmatprep.subr.bf16.mxu1 %v691_v4  ;;  %v149_v59 = vld [vmem:[%s1149_s1 + $0x3f8] sm:$0xff]  ;;  %v709_v61 = vpack.c.bf16 %v131_v55, %v130_v53  ;;  %v100_v63 = vld [vmem:[%s1149_s1 + $0x270] sm:$0xff]  ;;  %v18_v6 = vld [vmem:[%s1150_s0 + $0x20] sm:$0xff] }
  0x2d   :  { %662 = vmatpush3.bf16.msra.mxu0 %v661_v10  ;;  %v101_v0 = vld [vmem:[%s1149_s1 + $0x278] sm:$0xff]  ;;  %v711_v1 = vpack.c.bf16 %v149_v59, %v148_v58  ;;  %v132_v2 = vld [vmem:[%s1149_s1 + $0x370] sm:$0xff]  ;;  %v446_v9 = vld [vmem:[%s1151_s2] ss:$0 sm:$0xff] }
  0x2e   :  { %664 = vmatprep.subr.bf16.mxu0 %v663_v12  ;;  %v133_v3 = vld [vmem:[%s1149_s1 + $0x378] sm:$0xff]  ;;  %v681_v4 = vpack.c.bf16 %v101_v0, %v100_v63  ;;  %v20_v7 = vld [vmem:[%s1150_s0 + $0x30] sm:$0xff] }
  0x2f   :  { %694 = vmatpush3.bf16.msra.mxu1 %v693_v11  ;;  %v713_v5 = vpack.c.bf16 %v133_v3, %v132_v2 }
  0x30   :  { %696 = vmatprep.subr.bf16.mxu1 %v695_v16 }
  0x31   :  { %666 = vmatpush3.bf16.msra.mxu0 %v665_v22 }
  0x32   :  { %668 = vmatprep.subr.bf16.mxu0 %v667_v26 }
  0x33   :  { %698 = vmatpush3.bf16.msra.mxu1 %v697_v25 }
  0x34   :  { %700 = vmatprep.subr.bf16.mxu1 %v699_v30 }
  0x35   :  { %670 = vmatpush3.bf16.msra.mxu0 %v669_v36 }
  0x36   :  { %672 = vmatprep.subr.bf16.mxu0 %v671_v38 }
  0x37   :  { %702 = vmatpush3.bf16.msra.mxu1 %v701_v37 }
  0x38   :  { %704 = vmatprep.subr.bf16.mxu1 %v703_v42 }
  0x39   :  { %674 = vmatpush3.bf16.msra.mxu0 %v673_v48 }
  0x3a   :  { %676 = vmatprep.subr.bf16.mxu0 %v675_v50 }
  0x3b   :  { %706 = vmatpush3.bf16.msra.mxu1 %v705_v49 }
  0x3c   :  { %708 = vmatprep.subr.bf16.mxu1 %v707_v54 }
  0x3d   :  { %678 = vmatpush3.bf16.msra.mxu0 %v677_v60 }
  0x3e   :  { %680 = vmatprep.subr.bf16.mxu0 %v679_v62 }
  0x3f   :  { %710 = vmatpush3.bf16.msra.mxu1 %v709_v61 }
  0x40   :  { %712 = vmatprep.subr.bf16.mxu1 %v711_v1 }
  0x41   :  { %682 = vmatpush3.bf16.msra.mxu0 %v681_v4 }
  0x43   :  { %714 = vmatpush3.bf16.msra.mxu1 %v713_v5 }
  0x44   :  { %362 = vmatmul.mubr.f32.vlgmr.msra.gmra.mrb[2].mxu0 %v18_v6 }
  0x46   :  { %432 = vmatmul.mubr.f32.vlgmr.msra.gmra.mrb[2].mxu1 %v20_v7 }
  0xf7   :  { %v479_v8 = vpop.f32.mrb[0].mxu0 }
  0xf8   :  { %v480_v10 = vpop.f32.mrb[1].mxu0 }
  0xf9   :  { %v514_v11 = vpop.f32.mrb[0].mxu1  ;;  %v481_v12 = vadd.f32 %v480_v10, %v479_v8 }
  0xfa   :  { %v515_v13 = vpop.f32.mrb[1].mxu1 }
  0xfb   :  { %v516_v14 = vadd.f32 %v515_v13, %v514_v11  ;;  %v224_v15 = vadd.f32 %v481_v12, %v446_v9 }
  0xfd   :  { %v294_v16 = vadd.f32 %v516_v14, %v224_v15 }
 0x117   :  { %v549_v17 = vpop.f32.mrb[2].mxu0 }
 0x118   :  { %v550_v18 = vpop.f32.mrb[3].mxu0 }
 0x119   :  { %v584_v19 = vpop.f32.mrb[2].mxu1  ;;  %v551_v20 = vadd.f32 %v550_v18, %v549_v17 }
 0x11a   :  { %v585_v21 = vpop.f32.mrb[3].mxu1 }
 0x11b   :  { %v586_v22 = vadd.f32 %v585_v21, %v584_v19  ;;  %v364_v23 = vadd.f32 %v551_v20, %v294_v16 }
 0x11d   :  { %v434_v24 = vadd.f32 %v586_v22, %v364_v23 }
 0x11f   :  { %vm437_vm0 = vcmp.ge.f32.partialorder %v434_v24, 0.0  ;;  %v438_v25 = vmul.f32 0.2, %v434_v24 }
 0x121   :  { %v439_v26 = vsel %vm437_vm0, %v434_v24, %v438_v25 }
 0x122   :  { %441 = vst.msk [vmem:[%s1152_s3] sm:$0xff] %vm440_vm1, %v439_v26 }

// kernel: discriminator_forward.9
= control target key start
LH: loop header
LB: loop body
LE: loop exit
PB: predicated region body
PF: predicated region fallthrough
CT: control target
= control target key end

     0   :  { %v157_v0 = vmov 0.0|0.0   ;;  %vm158_vm0 = vmmov 0   ;;  %v159_v4 = vmov 0.0   ;;  %vm32_vm1 = vcmask 523264   ;;  %s213_s1 = inlined_call_operand.vmem [shape: f32[64,1], index: 1, kind: input, shape index: {}]   ;;  %s214_s2 = inlined_call_operand.<no memory space> [shape: f32[1,1], index: 2, kind: input, shape index: {}]   ;;  %s215_s0 = inlined_call_operand.vmem [shape: f32[8,64], index: 0, kind: input, shape index: {}]   ;;  %s216_s3 = inlined_call_operand.vmem [shape: f32[8,1], index: 3, kind: output, shape index: {}]  }
   0x1   :  { %142 = vmatprep.subr.bf16.mxu0 %v157_v0  ;;  %v17_v1 = vld [vmem:[%s213_s1] sm:$0xff]  ;;  %v18_v2 = vld [vmem:[%s213_s1 + $0x8] sm:$0xff]  ;;  %v19_v3 = vld [vmem:[%s213_s1 + $0x10] sm:$0xff]  ;;  %139 = vmatprep.mubr.msk.f32.mxu0 %vm158_vm0, %v159_v4  ;;  %v8_v5 = vstv %s214_s2  ;;  %vm106_vm2 = vcmask 7168  }
   0x2   :  { %v143_v6 = vpack.c.bf16 %v18_v2, %v17_v1  ;;  %v20_v7 = vld [vmem:[%s213_s1 + $0x18] sm:$0xff]  ;;  %9 = vst [vmem:[#allocation2] sm:$0x1] %v8_v5  ;;  %v21_v9 = vld [vmem:[%s213_s1 + $0x20] sm:$0xff]  ;;  %v22_v10 = vld [vmem:[%s213_s1 + $0x28] sm:$0xff] }
   0x3   :  { %v146_v8 = vpack.c.bf16 %v20_v7, %v19_v3  ;;  %v149_v11 = vpack.c.bf16 %v22_v10, %v21_v9  ;;  %v23_v12 = vld [vmem:[%s213_s1 + $0x30] sm:$0xff]  ;;  %v24_v13 = vld [vmem:[%s213_s1 + $0x38] sm:$0xff]  ;;  %v16_v15 = vld [vmem:[%s215_s0] sm:$0xff] }
   0x4   :  { %144 = vmatpush3.bf16.msra.mxu0 %v143_v6  ;;  %v152_v14 = vpack.c.bf16 %v24_v13, %v23_v12 }
   0x5   :  { %145 = vmatprep.subr.bf16.mxu0 %v157_v0 }
   0x8   :  { %147 = vmatpush3.bf16.msra.mxu0 %v146_v8 }
   0x9   :  { %148 = vmatprep.subr.bf16.mxu0 %v157_v0  ;;  %v112_v16 = vld [vmem:[#allocation2] ss:$0 sm:$0xff] }
   0xc   :  { %150 = vmatpush3.bf16.msra.mxu0 %v149_v11 }
   0xd   :  { %151 = vmatprep.subr.bf16.mxu0 %v157_v0 }
  0x10   :  { %153 = vmatpush3.bf16.msra.mxu0 %v152_v14 }
  0x13   :  { %140 = vmatmul.mubr.msk.f32.vlgmr.msra.gmra.mrb[0].mxu0 %vm32_vm1, %v16_v15 }
  0xe6   :  { %v102_v17 = vpop.f32.mrb[0].mxu0 }
  0xe7   :  { %v103_v18 = vadd.f32 %v112_v16, %v102_v17  ;;  %v141_v19 = vpop.f32.mrb[1].mxu0 }
  0xe9   :  { %107 = vst.msk [vmem:[%s216_s3] sm:$0xff] %vm106_vm2, %v103_v18 }

</bundles_post_ra>
